<compile_context>
chip_gen: v6e
topology: v6e:2x2x1
jax: 0.10.0
libtpu: 0.0.40
codegen_flags: <defaults>
</compile_context>

<pallas_src>
import jax
import jax.numpy as jnp
from jax.experimental import pallas as pl
from jax.experimental.pallas import tpu as pltpu


def _round_up(x, m):
    return ((x + m - 1) // m) * m


def _cdiv(a, b):
    return -(-a // b)


# --------------------------------------------------------------------------
# Kernel: one batch tile of the fused forward.
#   xt/xv/xa_ref : (TB, d_text) / (TB, d_vid) / (TB, d_audio)   bf16 inputs
#   wt/wv/wa_ref : (d_*, H)  bf16, nonzero only in that modality's 64 columns
#   bcat_ref     : (1, H)    f32 concatenated projection biases
#   wo_ref       : (H, C_pad) f32 fc_output weight (class dim padded to 8)
#   bo_ref       : (1, C_pad) f32 fc_output bias
#   out_ref      : (TB, C_pad) f32
# --------------------------------------------------------------------------
def fused_forward_kernel(xt_ref, xv_ref, xa_ref, wt_ref, wv_ref, wa_ref,
                         bcat_ref, wo_ref, bo_ref, out_ref):
    # Three per-modality projections; summation of the block-placed weights
    # realizes the lane-axis concat without any in-kernel concatenation.
    h = jnp.dot(xt_ref[...], wt_ref[...], preferred_element_type=jnp.float32)
    h = h + jnp.dot(xv_ref[...], wv_ref[...], preferred_element_type=jnp.float32)
    h = h + jnp.dot(xa_ref[...], wa_ref[...], preferred_element_type=jnp.float32)
    # Bias + ReLU in f32 (accumulator dtype; v5e VPU has no bf16 path).
    h = jnp.maximum(h + bcat_ref[...], 0.0)
    # fc_output: Linear(3*64, num_classes), narrow (<=8-lane) output.
    out = jnp.dot(h, wo_ref[...], preferred_element_type=jnp.float32) + bo_ref[...]
    out_ref[...] = out.astype(out_ref.dtype)


# --------------------------------------------------------------------------
# Offline parameter fusion: per-modality block-placed projection weights,
# concatenated biases, class-dim-padded fc_output weight/bias.
# --------------------------------------------------------------------------
def prepare_fused_params(params, d_text, d_vid, d_audio, feat=64,
                         act_dtype=jnp.bfloat16):
    wt, bt, wv, bv, wa, ba, wo, bo = params
    num_classes = wo.shape[1]
    H = 3 * feat                                   # 192
    C_pad = max(8, _round_up(num_classes, 8))      # narrow, masked-store output

    w_t = jnp.zeros((d_text, H), jnp.float32).at[:, 0:feat].set(wt).astype(act_dtype)
    w_v = jnp.zeros((d_vid, H), jnp.float32).at[:, feat:2 * feat].set(wv).astype(act_dtype)
    w_a = jnp.zeros((d_audio, H), jnp.float32).at[:, 2 * feat:3 * feat].set(wa).astype(act_dtype)

    b_cat = jnp.concatenate([bt, bv, ba], axis=1).astype(jnp.float32)      # (1, H)

    wo_pad = jnp.zeros((H, C_pad), jnp.float32).at[:, :num_classes].set(wo)
    bo_pad = jnp.zeros((1, C_pad), jnp.float32).at[:, :num_classes].set(bo)

    return (w_t, w_v, w_a, b_cat, wo_pad, bo_pad, num_classes)


# --------------------------------------------------------------------------
# Wrapper: cast activations to bf16, pad batch to the tile, launch kernel.
# --------------------------------------------------------------------------
def combined_model_forward(x_text, x_vid, x_audio, fused_params, *,
                           block_b=2048, act_dtype=jnp.bfloat16):
    w_t, w_v, w_a, b_cat, wo_pad, bo_pad, num_classes = fused_params
    B = x_text.shape[0]
    d_text, d_vid, d_audio = x_text.shape[1], x_vid.shape[1], x_audio.shape[1]
    C_pad = wo_pad.shape[1]

    xt = x_text.astype(act_dtype)
    xv = x_vid.astype(act_dtype)
    xa = x_audio.astype(act_dtype)

    # Balanced batch tile: multiple of 16 (bf16 packs 2 rows per sublane),
    # capped at block_b, and >= 2 grid steps when B > 16 so both v7x
    # TensorCores are used ("parallel" batch axis).
    ntiles = max(1, _cdiv(B, block_b))
    if B > 16:
        ntiles = max(ntiles, 2)
    tb = _round_up(_cdiv(B, ntiles), 16)
    B_pad = _round_up(B, tb)

    if B_pad != B:
        pad = ((0, B_pad - B), (0, 0))
        xt = jnp.pad(xt, pad)
        xv = jnp.pad(xv, pad)
        xa = jnp.pad(xa, pad)

    grid = (B_pad // tb,)

    out_pad = pl.pallas_call(
        fused_forward_kernel,
        out_shape=jax.ShapeDtypeStruct((B_pad, C_pad), jnp.float32),
        grid=grid,
        in_specs=[
            pl.BlockSpec((tb, d_text), lambda i: (i, 0)),     # x_text tile
            pl.BlockSpec((tb, d_vid), lambda i: (i, 0)),      # x_vid tile
            pl.BlockSpec((tb, d_audio), lambda i: (i, 0)),    # x_audio tile
            pl.BlockSpec(w_t.shape, lambda i: (0, 0)),        # text proj weight
            pl.BlockSpec(w_v.shape, lambda i: (0, 0)),        # video proj weight
            pl.BlockSpec(w_a.shape, lambda i: (0, 0)),        # audio proj weight
            pl.BlockSpec(b_cat.shape, lambda i: (0, 0)),      # concat bias
            pl.BlockSpec(wo_pad.shape, lambda i: (0, 0)),     # fc_output weight
            pl.BlockSpec(bo_pad.shape, lambda i: (0, 0)),     # fc_output bias
        ],
        out_specs=pl.BlockSpec((tb, C_pad), lambda i: (i, 0)),
        compiler_params=pltpu.CompilerParams(
            dimension_semantics=("parallel",),
            vmem_limit_bytes=32 * 1024 * 1024,
        ),
    )(xt, xv, xa, w_t, w_v, w_a, b_cat, wo_pad, bo_pad)

    # Strip batch / class padding.  NOTE: padded batch rows hold
    # relu(bias) @ wo + bo garbage, so this [:B] slice must be kept.
    return out_pad[:B, :num_classes]


# --------------------------------------------------------------------------
# Parameter init + pure-JAX f32 reference (unfused, un-padded) for validation.
# TODO(synk): the reference Combined_model takes arbitrary text/video/audio
# sub-models; they are unspecified, so they are modeled here as
# Linear(d_in, 64) + ReLU heads that fuse into the kernel.
# --------------------------------------------------------------------------
def init_params(key, d_text, d_vid, d_audio, feat=64, num_classes=4):
    ks = jax.random.split(key, 8)
    scale = 0.05
    wt = scale * jax.random.normal(ks[0], (d_text, feat), jnp.float32)
    bt = scale * jax.random.normal(ks[1], (1, feat), jnp.float32)
    wv = scale * jax.random.normal(ks[2], (d_vid, feat), jnp.float32)
    bv = scale * jax.random.normal(ks[3], (1, feat), jnp.float32)
    wa = scale * jax.random.normal(ks[4], (d_audio, feat), jnp.float32)
    ba = scale * jax.random.normal(ks[5], (1, feat), jnp.float32)
    wo = scale * jax.random.normal(ks[6], (3 * feat, num_classes), jnp.float32)
    bo = scale * jax.random.normal(ks[7], (1, num_classes), jnp.float32)
    return (wt, bt, wv, bv, wa, ba, wo, bo)


def reference_forward(x_text, x_vid, x_audio, params):
    (wt, bt, wv, bv, wa, ba, wo, bo) = params
    t = jnp.maximum(x_text @ wt + bt, 0.0)
    v = jnp.maximum(x_vid @ wv + bv, 0.0)
    a = jnp.maximum(x_audio @ wa + ba, 0.0)
    return jnp.concatenate([t, v, a], axis=1) @ wo + bo


if __name__ == "__main__":
    key = jax.random.PRNGKey(0)
    k_t, k_v, k_a, k_p = jax.random.split(key, 4)

    B, d_text, d_vid, d_audio, feat, num_classes = 2, 32, 48, 40, 64, 4
    x_text = jax.random.normal(k_t, (B, d_text), jnp.float32)
    x_vid = jax.random.normal(k_v, (B, d_vid), jnp.float32)
    x_audio = jax.random.normal(k_a, (B, d_audio), jnp.float32)

    params = init_params(k_p, d_text, d_vid, d_audio, feat=feat,
                         num_classes=num_classes)
    fused_params = prepare_fused_params(params, d_text, d_vid, d_audio, feat=feat)

    out = combined_model_forward(x_text, x_vid, x_audio, fused_params)
    jax.block_until_ready(out)

    ref = reference_forward(x_text, x_vid, x_audio, params)
    assert out.shape == (B, num_classes), out.shape
    # bf16 activations/projection weights -> loosened tolerance vs f32 ref.
    assert jnp.allclose(out, ref, atol=2e-2, rtol=2e-2)

    print("KERNEL_OK")
</pallas_src>

<mosaic_0001>
module attributes {stable_mosaic.version = 11 : i64} {
  func.func @fused_forward_kernel(%arg0: i32, %arg1: memref<16x32xbf16, #tpu.memory_space<vmem>>, %arg2: memref<16x48xbf16, #tpu.memory_space<vmem>>, %arg3: memref<16x40xbf16, #tpu.memory_space<vmem>>, %arg4: memref<32x192xbf16, #tpu.memory_space<vmem>>, %arg5: memref<48x192xbf16, #tpu.memory_space<vmem>>, %arg6: memref<40x192xbf16, #tpu.memory_space<vmem>>, %arg7: memref<1x192xf32, #tpu.memory_space<vmem>>, %arg8: memref<192x8xf32, #tpu.memory_space<vmem>>, %arg9: memref<1x8xf32, #tpu.memory_space<vmem>>, %arg10: memref<16x8xf32, #tpu.memory_space<vmem>>) attributes {dimension_semantics = [#tpu.dimension_semantics<parallel>], iteration_bounds = array<i64: 1>, scalar_prefetch = 0 : i64, scratch_operands = 0 : i64, tpu.core_type = #tpu.core_type<tc>, window_params = [{transform_indices = @transform_0, window_bounds = array<i64: 16, 32>}, {transform_indices = @transform_1, window_bounds = array<i64: 16, 48>}, {transform_indices = @transform_2, window_bounds = array<i64: 16, 40>}, {pipeline_mode = #tpu.pipeline_mode<synchronous>, transform_indices = @transform_3, window_bounds = array<i64: 32, 192>}, {pipeline_mode = #tpu.pipeline_mode<synchronous>, transform_indices = @transform_4, window_bounds = array<i64: 48, 192>}, {pipeline_mode = #tpu.pipeline_mode<synchronous>, transform_indices = @transform_5, window_bounds = array<i64: 40, 192>}, {pipeline_mode = #tpu.pipeline_mode<synchronous>, transform_indices = @transform_6, window_bounds = array<i64: 1, 192>}, {pipeline_mode = #tpu.pipeline_mode<synchronous>, transform_indices = @transform_7, window_bounds = array<i64: 192, 8>}, {pipeline_mode = #tpu.pipeline_mode<synchronous>, transform_indices = @transform_8, window_bounds = array<i64: 1, 8>}, {transform_indices = @transform_9, window_bounds = array<i64: 16, 8>}]} {
    %c0 = arith.constant 0 : index
    %c0_0 = arith.constant 0 : index
    %0 = vector.load %arg1[%c0, %c0_0] : memref<16x32xbf16, #tpu.memory_space<vmem>>, vector<16x32xbf16>
    %c0_1 = arith.constant 0 : index
    %c0_2 = arith.constant 0 : index
    %1 = vector.load %arg4[%c0_1, %c0_2] : memref<32x192xbf16, #tpu.memory_space<vmem>>, vector<32x192xbf16>
    %cst = arith.constant dense<0.000000e+00> : vector<16x192xf32>
    %2 = tpu.matmul %0, %1, %cst {dimension_numbers = #tpu.dot_dimension_numbers<[1], [0], [0], [1], [0, 0, 1, 1], [], []>} : vector<16x32xbf16>, vector<32x192xbf16>, vector<16x192xf32> -> vector<16x192xf32>
    %c0_3 = arith.constant 0 : index
    %c0_4 = arith.constant 0 : index
    %3 = vector.load %arg2[%c0_3, %c0_4] : memref<16x48xbf16, #tpu.memory_space<vmem>>, vector<16x48xbf16>
    %c0_5 = arith.constant 0 : index
    %c0_6 = arith.constant 0 : index
    %4 = vector.load %arg5[%c0_5, %c0_6] : memref<48x192xbf16, #tpu.memory_space<vmem>>, vector<48x192xbf16>
    %cst_7 = arith.constant dense<0.000000e+00> : vector<16x192xf32>
    %5 = tpu.matmul %3, %4, %cst_7 {dimension_numbers = #tpu.dot_dimension_numbers<[1], [0], [0], [1], [0, 0, 1, 1], [], []>} : vector<16x48xbf16>, vector<48x192xbf16>, vector<16x192xf32> -> vector<16x192xf32>
    %6 = arith.addf %2, %5 : vector<16x192xf32>
    %c0_8 = arith.constant 0 : index
    %c0_9 = arith.constant 0 : index
    %7 = vector.load %arg3[%c0_8, %c0_9] : memref<16x40xbf16, #tpu.memory_space<vmem>>, vector<16x40xbf16>
    %c0_10 = arith.constant 0 : index
    %c0_11 = arith.constant 0 : index
    %8 = vector.load %arg6[%c0_10, %c0_11] : memref<40x192xbf16, #tpu.memory_space<vmem>>, vector<40x192xbf16>
    %cst_12 = arith.constant dense<0.000000e+00> : vector<16x192xf32>
    %9 = tpu.matmul %7, %8, %cst_12 {dimension_numbers = #tpu.dot_dimension_numbers<[1], [0], [0], [1], [0, 0, 1, 1], [], []>} : vector<16x40xbf16>, vector<40x192xbf16>, vector<16x192xf32> -> vector<16x192xf32>
    %10 = arith.addf %6, %9 : vector<16x192xf32>
    %c0_13 = arith.constant 0 : index
    %c0_14 = arith.constant 0 : index
    %11 = vector.load %arg7[%c0_13, %c0_14] : memref<1x192xf32, #tpu.memory_space<vmem>>, vector<1x192xf32>
    %12 = vector.broadcast %11 : vector<1x192xf32> to vector<16x192xf32>
    %13 = arith.addf %10, %12 : vector<16x192xf32>
    %cst_15 = arith.constant 0.000000e+00 : f32
    %14 = vector.broadcast %cst_15 : f32 to vector<16x192xf32>
    %15 = arith.maximumf %13, %14 : vector<16x192xf32>
    %c0_16 = arith.constant 0 : index
    %c0_17 = arith.constant 0 : index
    %16 = vector.load %arg8[%c0_16, %c0_17] : memref<192x8xf32, #tpu.memory_space<vmem>>, vector<192x8xf32>
    %cst_18 = arith.constant dense<0.000000e+00> : vector<16x8xf32>
    %17 = tpu.matmul %15, %16, %cst_18 {dimension_numbers = #tpu.dot_dimension_numbers<[1], [0], [0], [1], [0, 0, 1, 1], [], []>} : vector<16x192xf32>, vector<192x8xf32>, vector<16x8xf32> -> vector<16x8xf32>
    %c0_19 = arith.constant 0 : index
    %c0_20 = arith.constant 0 : index
    %18 = vector.load %arg9[%c0_19, %c0_20] : memref<1x8xf32, #tpu.memory_space<vmem>>, vector<1x8xf32>
    %19 = vector.broadcast %18 : vector<1x8xf32> to vector<16x8xf32>
    %20 = arith.addf %17, %19 : vector<16x8xf32>
    %c0_21 = arith.constant 0 : index
    %c0_22 = arith.constant 0 : index
    %21 = vector.load %arg10[%c0_21, %c0_22] : memref<16x8xf32, #tpu.memory_space<vmem>>, vector<16x8xf32>
    tpu.vector_store %arg10[%c0_21, %c0_22], %20 {strides = array<i32>} : memref<16x8xf32, #tpu.memory_space<vmem>>, vector<16x8xf32>,
    return
  }
  func.func @transform_0(%arg0: i32) -> (i32, i32) {
    %c0_i32 = arith.constant 0 : i32
    %c0_i32_0 = arith.constant 0 : i32
    return %arg0, %c0_i32 : i32, i32
  }
  func.func @transform_1(%arg0: i32) -> (i32, i32) {
    %c0_i32 = arith.constant 0 : i32
    %c0_i32_0 = arith.constant 0 : i32
    return %arg0, %c0_i32 : i32, i32
  }
  func.func @transform_2(%arg0: i32) -> (i32, i32) {
    %c0_i32 = arith.constant 0 : i32
    %c0_i32_0 = arith.constant 0 : i32
    return %arg0, %c0_i32 : i32, i32
  }
  func.func @transform_3(%arg0: i32) -> (i32, i32) {
    %c0_i32 = arith.constant 0 : i32
    %c0_i32_0 = arith.constant 0 : i32
    %c0_i32_1 = arith.constant 0 : i32
    return %c0_i32, %c0_i32_0 : i32, i32
  }
  func.func @transform_4(%arg0: i32) -> (i32, i32) {
    %c0_i32 = arith.constant 0 : i32
    %c0_i32_0 = arith.constant 0 : i32
    %c0_i32_1 = arith.constant 0 : i32
    return %c0_i32, %c0_i32_0 : i32, i32
  }
  func.func @transform_5(%arg0: i32) -> (i32, i32) {
    %c0_i32 = arith.constant 0 : i32
    %c0_i32_0 = arith.constant 0 : i32
    %c0_i32_1 = arith.constant 0 : i32
    return %c0_i32, %c0_i32_0 : i32, i32
  }
  func.func @transform_6(%arg0: i32) -> (i32, i32) {
    %c0_i32 = arith.constant 0 : i32
    %c0_i32_0 = arith.constant 0 : i32
    %c0_i32_1 = arith.constant 0 : i32
    return %c0_i32, %c0_i32_0 : i32, i32
  }
  func.func @transform_7(%arg0: i32) -> (i32, i32) {
    %c0_i32 = arith.constant 0 : i32
    %c0_i32_0 = arith.constant 0 : i32
    %c0_i32_1 = arith.constant 0 : i32
    return %c0_i32, %c0_i32_0 : i32, i32
  }
  func.func @transform_8(%arg0: i32) -> (i32, i32) {
    %c0_i32 = arith.constant 0 : i32
    %c0_i32_0 = arith.constant 0 : i32
    %c0_i32_1 = arith.constant 0 : i32
    return %c0_i32, %c0_i32_0 : i32, i32
  }
  func.func @transform_9(%arg0: i32) -> (i32, i32) {
    %c0_i32 = arith.constant 0 : i32
    %c0_i32_0 = arith.constant 0 : i32
    return %arg0, %c0_i32 : i32, i32
  }
}

</mosaic_0001>

<bundles_post_ra>
// kernel: tpu_custom_call.1
= control target key start
LH: loop header
LB: loop body
LE: loop exit
PB: predicated region body
PF: predicated region fallthrough
CT: control target
= control target key end

     0   :  { %v490_v1 = vmov 0   ;;  %v491_v3 = vmov 0.0   ;;  %vm82_vm0 = vcmask 392192   ;;  %vm242_vm1 = vcmask 1043456   ;;  %s704_s4 = inlined_call_operand.vmem [shape: bf16[48,192], index: 4, kind: input, shape index: {}]   ;;  %s705_s1 = inlined_call_operand.vmem [shape: bf16[16,48], index: 1, kind: input, shape index: {}]   ;;  %s706_s3 = inlined_call_operand.vmem [shape: bf16[32,192], index: 3, kind: input, shape index: {}]   ;;  %s707_s0 = inlined_call_operand.vmem [shape: bf16[16,32], index: 0, kind: input, shape index: {}]   ;;  %s708_s5 = inlined_call_operand.vmem [shape: bf16[40,192], index: 5, kind: input, shape index: {}]   ;;  %s709_s7 = inlined_call_operand.vmem [shape: f32[192,8], index: 7, kind: input, shape index: {}]   ;;  %s710_s2 = inlined_call_operand.vmem [shape: bf16[16,40], index: 2, kind: input, shape index: {}]   ;;  %s711_s6 = inlined_call_operand.vmem [shape: f32[1,192], index: 6, kind: input, shape index: {}]   ;;  %s712_s8 = inlined_call_operand.vmem [shape: f32[1,8], index: 8, kind: input, shape index: {}]   ;;  %s713_s9 = inlined_call_operand.vmem [shape: f32[16,8], index: 9, kind: output, shape index: {}]  }
   0x1   :  { %v464_v0 = vld [vmem:[%s704_s4 + $0x24] ss:$8 sps:$4 sm:$0xff]   ;;  %118 = vmatprep.mubr.bf16.mxu1 %v490_v1  ;;  %v466_v2 = vld [vmem:[%s704_s4 + $0x20] ss:$8 sps:$4 sm:$0xff]   ;;  %354 = vmatprep.subr.mxu0 %v491_v3  ;;  %v467_v4 = vld [vmem:[%s704_s4 + $0x14] ss:$8 sps:$4 sm:$0xff]   ;;  %v298_v52 = vlaneseq }
   0x2   :  { %96 = vmatprep.subr.bf16.mxu1 %v464_v0  ;;  %v469_v5 = vld [vmem:[%s704_s4 + $0x10] ss:$8 sps:$4 sm:$0xff]   ;;  %v470_v6 = vld [vmem:[%s704_s4 + $0x4] ss:$8 sps:$4 sm:$0xff]   ;;  %v472_v7 = vld [vmem:[%s704_s4] ss:$8 sps:$4 sm:$0xff]  }
   0x3   :  { %97 = vmatpush1.bf16.msra.mxu1 %v466_v2  ;;  %v476_v8 = vld [vmem:[%s706_s3 + $0x14] ss:$8 sps:$4 sm:$0xff]   ;;  %v473_v9 = vld [vmem:[%s705_s1] sm:$0xff]   ;;  %v474_v10 = vld [vmem:[%s706_s3 + $0x10] ss:$8 sps:$4 sm:$0xff]   ;;  %vm154_vm2 = vcmask 261120  }
   0x4   :  { %98 = vmatprep.subr.bf16.mxu1 %v467_v4  ;;  %v479_v11 = vld [vmem:[%s706_s3 + $0x4] ss:$8 sps:$4 sm:$0xff]   ;;  %v331_v12 = vld [vmem:[%s709_s7 + $0x78] sm:$0xff]  ;;  %v330_v14 = vld [vmem:[%s709_s7 + $0x70] sm:$0xff]  ;;  %vm238_vm3 = vcmask 326656   ;;  %v299_v54 = vshrl.u32 %v298_v52, 7 }
   0x5   :  { %v207_v13 = vld [vmem:[%s708_s5 + $0x20] sm:$0xff]  ;;  %355 = vmatpush1.msra.mxu0 %v331_v12  ;;  %v329_v16 = vld [vmem:[%s709_s7 + $0x68] sm:$0xff]  ;;  %v327_v21 = vld [vmem:[%s709_s7 + $0x58] sm:$0xff]  ;;  %vm347_vm4 = vcmask 523264   ;;  %vm429_vm5 = vcmask 64512  }
   0x6   :  { %356 = vmatprep.subr.mxu0 %v491_v3  ;;  %v477_v15 = vld [vmem:[%s706_s3] ss:$8 sps:$4 sm:$0xff]   ;;  %v456_v17 = vcombine.high %v207_v13, %v207_v13  ;;  %v455_v18 = vcombine.low %v207_v13, %v207_v13  ;;  %v485_v23 = vld [vmem:[%s708_s5 + $0x14] ss:$8 sps:$4 sm:$0xff]   ;;  %v483_v25 = vld [vmem:[%s708_s5 + $0x10] ss:$8 sps:$4 sm:$0xff]  }
   0x7   :  { %99 = vmatpush1.bf16.msra.mxu1 %v469_v5  ;;  %357 = vmatpush1.msra.mxu0 %v330_v14  ;;  %v328_v19 = vld [vmem:[%s709_s7 + $0x60] sm:$0xff]  ;;  %v326_v24 = vld [vmem:[%s709_s7 + $0x50] sm:$0xff]  ;;  %v325_v27 = vld [vmem:[%s709_s7 + $0x48] sm:$0xff]  ;;  %v300_v56 = vsub.s32 0, %v299_v54  ;;  %v304_v58 = vsub.s32 1, %v299_v54 }
   0x8   :  { %100 = vmatprep.subr.bf16.mxu1 %v470_v6  ;;  %358 = vmatprep.subr.mxu0 %v491_v3  ;;  %v480_v20 = vld [vmem:[%s707_s0] sm:$0xff]   ;;  %v244_v22 = vsel %vm242_vm1, %v455_v18, 0  ;;  %v323_v30 = vld [vmem:[%s709_s7 + $0x38] sm:$0xff]  ;;  %v322_v32 = vld [vmem:[%s709_s7 + $0x30] sm:$0xff] }
   0x9   :  { %359 = vmatpush1.msra.mxu0 %v329_v16  ;;  %v488_v26 = vld [vmem:[%s708_s5 + $0x4] ss:$8 sps:$4 sm:$0xff]   ;;  %v486_v29 = vld [vmem:[%s708_s5] ss:$8 sps:$4 sm:$0xff]   ;;  %v319_v35 = vld [vmem:[%s709_s7 + $0x18] sm:$0xff] }
   0xa   :  { %360 = vmatprep.subr.mxu0 %v491_v3  ;;  %v324_v28 = vld [vmem:[%s709_s7 + $0x40] sm:$0xff]  ;;  %v321_v33 = vld [vmem:[%s709_s7 + $0x28] sm:$0xff]  ;;  %v318_v36 = vld [vmem:[%s709_s7 + $0x10] sm:$0xff] }
   0xb   :  { %101 = vmatpush1.bf16.msra.mxu1 %v472_v7  ;;  %361 = vmatpush1.msra.mxu0 %v328_v19  ;;  %v489_v31 = vld [vmem:[%s710_s2] sm:$0xff]   ;;  %v317_v37 = vld [vmem:[%s709_s7 + $0x8] sm:$0xff]  ;;  %v339_v39 = vld [vmem:[%s709_s7 + $0xb8] sm:$0xff] }
   0xc   :  { %170 = vmatprep.subr.bf16.mxu1 %v476_v8  ;;  %362 = vmatprep.subr.mxu0 %v491_v3  ;;  %v320_v34 = vld [vmem:[%s709_s7 + $0x20] sm:$0xff]  ;;  %v338_v40 = vld [vmem:[%s709_s7 + $0xb0] sm:$0xff]  ;;  %v337_v41 = vld [vmem:[%s709_s7 + $0xa8] sm:$0xff] }
   0xd   :  { %363 = vmatpush1.msra.mxu0 %v327_v21  ;;  %v316_v38 = vld [vmem:[%s709_s7] sm:$0xff]  ;;  %v335_v43 = vld [vmem:[%s709_s7 + $0x98] sm:$0xff]  ;;  %v334_v44 = vld [vmem:[%s709_s7 + $0x90] sm:$0xff] }
   0xe   :  { %443 = vmatmul.mubr.msk.bf16.vlgmr.msra.gmra.mxu1 %vm82_vm0, %v473_v9  ;;  %364 = vmatprep.subr.mxu0 %v491_v3  ;;  %v336_v42 = vld [vmem:[%s709_s7 + $0xa0] sm:$0xff]  ;;  %v333_v45 = vld [vmem:[%s709_s7 + $0x88] sm:$0xff] }
   0xf   :  { %171 = vmatpush1.bf16.msra.mxu1 %v474_v10  ;;  %190 = vmatprep.mubr.bf16.mxu1 %v490_v1  ;;  %v332_v46 = vld [vmem:[%s709_s7 + $0x80] sm:$0xff] }
  0x10   :  { %172 = vmatprep.subr.bf16.mxu1 %v479_v11  ;;  %365 = vmatpush1.msra.mxu0 %v326_v24  ;;  %v296_v57 = vld [vmem:[%s711_s6] sm:$0x3] }
  0x11   :  { %366 = vmatprep.subr.mxu0 %v491_v3  ;;  %v301_v62 = vrot.slane %v296_v57, %v300_v56  ;;  %v459_v18 = vld [vmem:[%s712_s8] ss:$0 sm:$0xff] }
  0x12   :  { %367 = vmatpush1.msra.mxu0 %v325_v27 }
  0x13   :  { %173 = vmatpush1.bf16.msra.mxu1 %v477_v15  ;;  %368 = vmatprep.subr.mxu0 %v491_v3 }
  0x14   :  { %457 = vmatprep.subr.msk.bf16.mxu1 %vm242_vm1, %v456_v17  ;;  %369 = vmatpush1.msra.mxu0 %v324_v28 }
  0x15   :  { %370 = vmatprep.subr.mxu0 %v491_v3 }
  0x16   :  { %449 = vmatmul.mubr.msk.bf16.vlgmr.msra.gmra.mxu1 %vm154_vm2, %v480_v20  ;;  %371 = vmatpush1.msra.mxu0 %v323_v30 }
  0x17   :  { %260 = vmatpush1.bf16.msra.mxu1 %v244_v22  ;;  %281 = vmatprep.mubr.bf16.mxu1 %v490_v1  ;;  %v305_v1 = vrot.slane %v296_v57, %v304_v58 }
  0x18   :  { %261 = vmatprep.subr.bf16.mxu1 %v485_v23  ;;  %372 = vmatprep.subr.mxu0 %v491_v3 }
  0x19   :  { %373 = vmatpush1.msra.mxu0 %v322_v32 }
  0x1a   :  { %374 = vmatprep.subr.mxu0 %v491_v3 }
  0x1b   :  { %262 = vmatpush1.bf16.msra.mxu1 %v483_v25  ;;  %375 = vmatpush1.msra.mxu0 %v321_v33 }
  0x1c   :  { %263 = vmatprep.subr.bf16.mxu1 %v488_v26  ;;  %376 = vmatprep.subr.mxu0 %v491_v3 }
  0x1d   :  { %377 = vmatpush1.msra.mxu0 %v320_v34 }
  0x1e   :  { %378 = vmatprep.subr.mxu0 %v491_v3 }
  0x1f   :  { %264 = vmatpush1.bf16.msra.mxu1 %v486_v29  ;;  %379 = vmatpush1.msra.mxu0 %v319_v35 }
  0x20   :  { %380 = vmatprep.subr.mxu0 %v491_v3 }
  0x21   :  { %381 = vmatpush1.msra.mxu0 %v318_v36 }
  0x22   :  { %458 = vmatmul.mubr.msk.bf16.vlgmr.msra.gmra.mxu1 %vm238_vm3, %v489_v31  ;;  %382 = vmatprep.subr.mxu0 %v491_v3 }
  0x23   :  { %383 = vmatpush1.msra.mxu0 %v317_v37 }
  0x24   :  { %384 = vmatprep.subr.mxu0 %v491_v3 }
  0x25   :  { %385 = vmatpush1.msra.mxu0 %v316_v38 }
  0x26   :  { %402 = vmatprep.subr.mxu0 %v491_v3 }
  0x27   :  { %403 = vmatpush2.msra.mxu0 %v339_v39 }
  0x28   :  { %404 = vmatprep.subr.mxu0 %v491_v3 }
  0x29   :  { %405 = vmatpush2.msra.mxu0 %v338_v40 }
  0x2a   :  { %406 = vmatprep.subr.mxu0 %v491_v3 }
  0x2b   :  { %407 = vmatpush2.msra.mxu0 %v337_v41 }
  0x2c   :  { %408 = vmatprep.subr.mxu0 %v491_v3 }
  0x2d   :  { %409 = vmatpush2.msra.mxu0 %v336_v42 }
  0x2e   :  { %410 = vmatprep.subr.mxu0 %v491_v3 }
  0x2f   :  { %411 = vmatpush2.msra.mxu0 %v335_v43 }
  0x30   :  { %412 = vmatprep.subr.mxu0 %v491_v3 }
  0x31   :  { %413 = vmatpush2.msra.mxu0 %v334_v44 }
  0x32   :  { %414 = vmatprep.subr.mxu0 %v491_v3 }
  0x33   :  { %415 = vmatpush2.msra.mxu0 %v333_v45 }
  0x34   :  { %416 = vmatprep.subr.mxu0 %v491_v3 }
  0x35   :  { %417 = vmatpush2.msra.mxu0 %v332_v46 }
  0xce   :  { %v120_v47 = vpop.f32.mrf.mxu1 }
  0xd0   :  { %v122_v48 = vpop.f32.mrf.mxu1 }
  0xd2   :  { %v124_v49 = vpop.f32.mrf.mxu1 }
  0xd4   :  { %v126_v50 = vpop.f32.mrf.mxu1 }
  0xd6   :  { %v192_v51 = vpop.f32.mrf.mxu1 }
  0xd7   :  { %v193_v60 = vadd.f32 %v192_v51, %v120_v47 }
  0xd8   :  { %v194_v53 = vpop.f32.mrf.mxu1 }
  0xd9   :  { %v195_v63 = vadd.f32 %v194_v53, %v122_v48 }
  0xda   :  { %v196_v55 = vpop.f32.mrf.mxu1 }
  0xdb   :  { %v197_v3 = vadd.f32 %v196_v55, %v124_v49 }
  0xdc   :  { %v198_v59 = vpop.f32.mrf.mxu1 }
  0xdd   :  { %v199_v7 = vadd.f32 %v198_v59, %v126_v50 }
  0xe2   :  { %v283_v61 = vpop.f32.mrf.mxu1 }
  0xe3   :  { %v292_v0 = vadd.f32 %v283_v61, %v193_v60 }
  0xe4   :  { %v285_v2 = vpop.f32.mrf.mxu1 }
  0xe5   :  { %v293_v4 = vadd.f32 %v285_v2, %v195_v63  ;;  %v308_v5 = vadd.f32 %v301_v62, %v292_v0 }
  0xe6   :  { %v287_v6 = vpop.f32.mrf.mxu1 }
  0xe7   :  { %v294_v8 = vadd.f32 %v287_v6, %v197_v3  ;;  %v309_v9 = vadd.f32 %v305_v1, %v293_v4  ;;  %v312_v13 = vmax.f32 %v308_v5, 0.0 }
  0xe8   :  { %v289_v10 = vpop.f32.mrf.mxu1 }
  0xe9   :  { %v295_v11 = vadd.f32 %v289_v10, %v199_v7  ;;  %v313_v12 = vmax.f32 %v309_v9, 0.0  ;;  %v310_v14 = vadd.f32 %v301_v62, %v294_v8 }
  0xeb   :  { %v311_v15 = vadd.f32 %v305_v1, %v295_v11  ;;  %460 = vmatprep.mubr.msk.f32.mxu0 %vm347_vm4, %v313_v12  ;;  %v314_v17 = vmax.f32 %v310_v14, 0.0 }
  0xec   :  { %419 = vmatmul.mubr.f32.vlgmr.msra.gmra.mxu0 %v312_v13 }
  0xed   :  { %v315_v16 = vmax.f32 %v311_v15, 0.0 }
  0xef   :  { %461 = vmatprep.mubr.msk.f32.mxu0 %vm347_vm4, %v315_v16 }
  0xf0   :  { %424 = vmatmul.mubr.f32.gmra.mxu0 %v314_v17 }
 0x1ac   :  { %v420_v19 = vpop.f32.mrf.mxu0 }
 0x1ad   :  { %v421_v20 = vadd.f32 %v459_v18, %v420_v19 }
 0x1ae   :  { %v422_v21 = vpop.f32.mrf.mxu0 }
 0x1af   :  { %430 = vst.msk [vmem:[%s713_s9] sm:$0xff] %vm429_vm5, %v421_v20 }
 0x1b0   :  { %v425_v22 = vpop.f32.mrf.mxu0 }
 0x1b1   :  { %v426_v23 = vadd.f32 %v459_v18, %v425_v22 }
 0x1b2   :  { %v427_v24 = vpop.f32.mrf.mxu0 }
 0x1b3   :  { %431 = vst.msk [vmem:[%s713_s9 + $0x8] sm:$0xff] %vm429_vm5, %v426_v23 }

</bundles_post_ra>
